<compile_context>
chip_gen: v5e
topology: v5e:2x2
jax: 0.10.0
libtpu: 0.0.40
codegen_flags: <defaults>
</compile_context>

<pallas_src>
import math

import jax
import jax.numpy as jnp
from jax.experimental import pallas as pl
from jax.experimental.pallas import tpu as pltpu


def _round_up(x, m):
    return (x + m - 1) // m * m


def _apply_act(y, act):
    """Activation on the f32 accumulator (matches torch semantics)."""
    if act == "ReLU":
        return jnp.maximum(y, 0.0)
    elif act == "Hardswish":
        # x * relu6(x + 3) / 6  (matches torch.nn.Hardswish)
        return y * jnp.clip(y + 3.0, 0.0, 6.0) * (1.0 / 6.0)
    raise ValueError(f"unsupported act: {act}")


def _make_fused_mlp_kernel(num_layers, act, compute_dtype):
    """Builds a kernel: refs = (x, w0, b0, w1, b1, ..., out)."""

    def kernel(*refs):
        x_ref = refs[0]
        o_ref = refs[1 + 2 * num_layers]

        # In-kernel cast to the MXU dtype -- avoids a wrapper-side HBM copy.
        h = x_ref[...].astype(compute_dtype)          # (tm, K)
        for l in range(num_layers):
            w_ref = refs[1 + 2 * l]                   # (K_l, N_pad_l), compute_dtype
            b_ref = refs[2 + 2 * l]                   # (1, N_pad_l), f32
            y = jnp.dot(h, w_ref[...], preferred_element_type=jnp.float32)
            y = _apply_act(y + b_ref[...], act)       # f32 epilogue on the VPU
            if l < num_layers - 1:
                h = y.astype(compute_dtype)           # back to MXU dtype
            else:
                h = y
        o_ref[...] = h.astype(o_ref.dtype)            # bf16 writeback

    return kernel


def fused_mlp(x, weights, biases, act, *, tm, compute_dtype):
    """Single fused pallas_call over all layers.

    x:          (M, K) f32/bf16 -- unpadded, K = input_dim
    weights[l]: (K_l, N_pad_l) compute_dtype, lane-padded on N, zero-padded
    biases[l]:  (1, N_pad_l) f32, zero-padded
    returns:    (M, N_pad_last) bf16
    """
    M, K = x.shape
    num_layers = len(weights)
    n_last = weights[-1].shape[1]
    grid = (pl.cdiv(M, tm),)       # non-divisible grids OK: last tile is masked

    in_specs = [pl.BlockSpec((tm, K), lambda i: (i, 0))]   # batch tile of x
    flat_params = []
    for w, b in zip(weights, biases):
        # Constant index maps -> weights/biases stay resident in VMEM.
        in_specs.append(pl.BlockSpec(w.shape, lambda i: (0, 0)))
        in_specs.append(pl.BlockSpec(b.shape, lambda i: (0, 0)))
        flat_params += [w, b]

    kernel = _make_fused_mlp_kernel(num_layers, act, compute_dtype)

    # VMEM budget: double-buffered activation tiles + (over-counted) resident
    # params; set the scoped limit explicitly so big tm is safe on v5e/v7x.
    params_bytes = sum(int(p.size) * p.dtype.itemsize for p in flat_params)
    act_tile_bytes = tm * K * x.dtype.itemsize + tm * n_last * 2   # in f32/bf16 + out bf16
    vmem_need = 2 * act_tile_bytes + 2 * params_bytes
    vmem_limit = min(max(int(1.5 * vmem_need) + (1 << 20), 16 << 20), 48 << 20)

    flops = 2 * M * sum(int(w.shape[0]) * int(w.shape[1]) for w in weights)
    bytes_accessed = (int(x.size) * x.dtype.itemsize
                      + params_bytes
                      + M * n_last * 2)

    return pl.pallas_call(
        kernel,
        out_shape=jax.ShapeDtypeStruct((M, n_last), jnp.bfloat16),
        grid_spec=pltpu.PrefetchScalarGridSpec(
            num_scalar_prefetch=0,
            grid=grid,
            in_specs=in_specs,
            out_specs=pl.BlockSpec((tm, n_last), lambda i: (i, 0)),
        ),
        compiler_params=pltpu.CompilerParams(
            dimension_semantics=("parallel",),   # megacore-shards the batch axis
            vmem_limit_bytes=vmem_limit,
        ),
        cost_estimate=pl.CostEstimate(
            flops=flops, transcendentals=0, bytes_accessed=bytes_accessed),
    )(x, *flat_params)


class MLP:
    """JAX/Pallas port of the PyTorch MLP module."""

    def __init__(self, act, net_dim, input_dim=784, out_dim=10, *,
                 key, compute_dtype=jnp.bfloat16, tm=1024, min_split=128):
        assert act in ("Hardswish", "ReLU")
        self.act = act
        self.net_dim = list(net_dim)
        self.input_dim = input_dim
        self.out_dim = out_dim
        self.compute_dtype = compute_dtype
        self.tm = tm                 # max batch tile (DMA/overhead knob)
        self.min_split = min_split   # split into >=2 tiles once m >= 2*min_split

        # Reproduce make_net() layer-shape logic exactly (incl. the quirk that
        # net_dim[-1] is never used as a width).
        layer_dims = []
        last_dim = input_dim
        for i in range(len(self.net_dim)):
            if i == len(self.net_dim) - 1:
                layer_dims.append((last_dim, out_dim))
            else:
                layer_dims.append((last_dim, self.net_dim[i]))
            last_dim = self.net_dim[i]

        # Deterministic init mimicking torch.nn.Linear's default
        # U(-1/sqrt(fan_in), 1/sqrt(fan_in)).  Weights stored as [in, out].
        self.params_f32 = []       # unpadded f32 (for the pure-JAX reference)
        self.kernel_weights = []   # lane-padded on N, compute_dtype
        self.kernel_biases = []    # lane-padded on N, f32
        for li, (d_in, d_out) in enumerate(layer_dims):
            key, kw, kb = jax.random.split(key, 3)
            bound = 1.0 / math.sqrt(d_in)
            w_t = jax.random.uniform(kw, (d_in, d_out), jnp.float32, -bound, bound)
            b = jax.random.uniform(kb, (1, d_out), jnp.float32, -bound, bound)
            self.params_f32.append((w_t, b))

            # Layer 0's K matches the UNPADDED input features (x is fed as-is);
            # later layers' K matches the previous layer's 128-padded output.
            k_dim = d_in if li == 0 else _round_up(d_in, 128)
            n_pad = _round_up(d_out, 128)
            w_pad = jnp.zeros((k_dim, n_pad), compute_dtype)
            w_pad = w_pad.at[:d_in, :d_out].set(w_t.astype(compute_dtype))
            b_pad = jnp.zeros((1, n_pad), jnp.float32)
            b_pad = b_pad.at[:, :d_out].set(b)
            self.kernel_weights.append(w_pad)
            self.kernel_biases.append(b_pad)

    def _choose_tm(self, m):
        tm_max = self.tm
        # Small batch: one exact tile (block dims == full array dims; no pad,
        # no partial tile, minimal launch overhead).
        if m < 2 * self.min_split:
            return m
        # Large batch: >=2 (even) balanced grid steps -> both v7x TensorCores
        # get work, and a batch just above a tile boundary doesn't waste ~2x.
        n_tiles = max(2, pl.cdiv(m, tm_max))
        if n_tiles % 2:
            n_tiles += 1
        return min(_round_up(pl.cdiv(m, n_tiles), 16), tm_max)

    def __call__(self, x):
        x = x.reshape(-1, self.input_dim)          # metadata-only reshape
        if x.dtype not in (jnp.float32, jnp.bfloat16):
            x = x.astype(jnp.float32)
        m = x.shape[0]
        tm = self._choose_tm(m)

        out = fused_mlp(x, self.kernel_weights, self.kernel_biases, self.act,
                        tm=tm, compute_dtype=self.compute_dtype)
        # Slice the true out_dim (padded lanes are exactly zero) and match
        # torch's f32 output dtype on the tiny (m, out_dim) result.
        return out[:, :self.out_dim].astype(jnp.float32)

    # Pure-JAX reference (no Pallas) using the same dtype policy
    # (bf16 operands, f32 accumulation, f32 epilogue) for correctness checks.
    def reference(self, x):
        x = x.reshape(-1, self.input_dim).astype(jnp.float32)
        for (w_t, b) in self.params_f32:
            y = jnp.dot(x.astype(self.compute_dtype),
                        w_t.astype(self.compute_dtype),
                        preferred_element_type=jnp.float32) + b
            x = _apply_act(y, self.act)
        return x


if __name__ == "__main__":
    key = jax.random.PRNGKey(0)
    key_model, key_x = jax.random.split(key)

    # Small MNIST-like setup: batch=8, input 1x28x28 -> 784 features.
    model = MLP(act="Hardswish", net_dim=[128, 64],
                input_dim=784, out_dim=10, key=key_model)

    x = jax.random.normal(key_x, (8, 1, 28, 28), jnp.float32)

    out = model(x)
    out = jax.block_until_ready(out)

    ref = model.reference(x)
    assert out.shape == (8, 10), out.shape
    # Kernel writes bf16 (halved HBM writeback); tolerance covers the bf16
    # rounding of the final store on O(1)-magnitude outputs.
    assert jnp.allclose(out, ref, rtol=2e-2, atol=2e-2), "mismatch vs reference"

    print("KERNEL_OK")
</pallas_src>

<mosaic_0001>
module attributes {stable_mosaic.version = 11 : i64} {
  func.func @kernel(%arg0: i32, %arg1: memref<8x784xf32, #tpu.memory_space<vmem>>, %arg2: memref<784x128xbf16, #tpu.memory_space<vmem>>, %arg3: memref<1x128xf32, #tpu.memory_space<vmem>>, %arg4: memref<128x128xbf16, #tpu.memory_space<vmem>>, %arg5: memref<1x128xf32, #tpu.memory_space<vmem>>, %arg6: memref<8x128xbf16, #tpu.memory_space<vmem>>) attributes {dimension_semantics = [#tpu.dimension_semantics<parallel>], iteration_bounds = array<i64: 1>, scalar_prefetch = 0 : i64, scratch_operands = 0 : i64, tpu.core_type = #tpu.core_type<tc>, window_params = [{transform_indices = @transform_0, window_bounds = array<i64: 8, 784>}, {pipeline_mode = #tpu.pipeline_mode<synchronous>, transform_indices = @transform_1, window_bounds = array<i64: 784, 128>}, {pipeline_mode = #tpu.pipeline_mode<synchronous>, transform_indices = @transform_2, window_bounds = array<i64: 1, 128>}, {pipeline_mode = #tpu.pipeline_mode<synchronous>, transform_indices = @transform_3, window_bounds = array<i64: 128, 128>}, {pipeline_mode = #tpu.pipeline_mode<synchronous>, transform_indices = @transform_4, window_bounds = array<i64: 1, 128>}, {transform_indices = @transform_5, window_bounds = array<i64: 8, 128>}]} {
    %c0 = arith.constant 0 : index
    %c0_0 = arith.constant 0 : index
    %0 = vector.load %arg1[%c0, %c0_0] : memref<8x784xf32, #tpu.memory_space<vmem>>, vector<8x784xf32>
    %1 = arith.truncf %0 : vector<8x784xf32> to vector<8x784xbf16>
    %c0_1 = arith.constant 0 : index
    %c0_2 = arith.constant 0 : index
    %2 = vector.load %arg2[%c0_1, %c0_2] : memref<784x128xbf16, #tpu.memory_space<vmem>>, vector<784x128xbf16>
    %cst = arith.constant dense<0.000000e+00> : vector<8x128xf32>
    %3 = tpu.matmul %1, %2, %cst {dimension_numbers = #tpu.dot_dimension_numbers<[1], [0], [0], [1], [0, 0, 1, 1], [], []>} : vector<8x784xbf16>, vector<784x128xbf16>, vector<8x128xf32> -> vector<8x128xf32>
    %c0_3 = arith.constant 0 : index
    %c0_4 = arith.constant 0 : index
    %4 = vector.load %arg3[%c0_3, %c0_4] : memref<1x128xf32, #tpu.memory_space<vmem>>, vector<1x128xf32>
    %5 = vector.broadcast %4 : vector<1x128xf32> to vector<8x128xf32>
    %6 = arith.addf %3, %5 : vector<8x128xf32>
    %cst_5 = arith.constant 3.000000e+00 : f32
    %7 = vector.broadcast %cst_5 : f32 to vector<8x128xf32>
    %8 = arith.addf %6, %7 : vector<8x128xf32>
    %cst_6 = arith.constant 0.000000e+00 : f32
    %cst_7 = arith.constant 6.000000e+00 : f32
    %9 = vector.broadcast %cst_6 : f32 to vector<8x128xf32>
    %10 = arith.maximumf %9, %8 : vector<8x128xf32>
    %11 = vector.broadcast %cst_7 : f32 to vector<8x128xf32>
    %12 = arith.minimumf %11, %10 : vector<8x128xf32>
    %13 = arith.mulf %6, %12 : vector<8x128xf32>
    %cst_8 = arith.constant 0.166666672 : f32
    %14 = vector.broadcast %cst_8 : f32 to vector<8x128xf32>
    %15 = arith.mulf %13, %14 : vector<8x128xf32>
    %16 = arith.truncf %15 : vector<8x128xf32> to vector<8x128xbf16>
    %c0_9 = arith.constant 0 : index
    %c0_10 = arith.constant 0 : index
    %17 = vector.load %arg4[%c0_9, %c0_10] : memref<128x128xbf16, #tpu.memory_space<vmem>>, vector<128x128xbf16>
    %cst_11 = arith.constant dense<0.000000e+00> : vector<8x128xf32>
    %18 = tpu.matmul %16, %17, %cst_11 {dimension_numbers = #tpu.dot_dimension_numbers<[1], [0], [0], [1], [0, 0, 1, 1], [], []>} : vector<8x128xbf16>, vector<128x128xbf16>, vector<8x128xf32> -> vector<8x128xf32>
    %c0_12 = arith.constant 0 : index
    %c0_13 = arith.constant 0 : index
    %19 = vector.load %arg5[%c0_12, %c0_13] : memref<1x128xf32, #tpu.memory_space<vmem>>, vector<1x128xf32>
    %20 = vector.broadcast %19 : vector<1x128xf32> to vector<8x128xf32>
    %21 = arith.addf %18, %20 : vector<8x128xf32>
    %cst_14 = arith.constant 3.000000e+00 : f32
    %22 = vector.broadcast %cst_14 : f32 to vector<8x128xf32>
    %23 = arith.addf %21, %22 : vector<8x128xf32>
    %cst_15 = arith.constant 0.000000e+00 : f32
    %cst_16 = arith.constant 6.000000e+00 : f32
    %24 = vector.broadcast %cst_15 : f32 to vector<8x128xf32>
    %25 = arith.maximumf %24, %23 : vector<8x128xf32>
    %26 = vector.broadcast %cst_16 : f32 to vector<8x128xf32>
    %27 = arith.minimumf %26, %25 : vector<8x128xf32>
    %28 = arith.mulf %21, %27 : vector<8x128xf32>
    %cst_17 = arith.constant 0.166666672 : f32
    %29 = vector.broadcast %cst_17 : f32 to vector<8x128xf32>
    %30 = arith.mulf %28, %29 : vector<8x128xf32>
    %31 = arith.truncf %30 : vector<8x128xf32> to vector<8x128xbf16>
    %c0_18 = arith.constant 0 : index
    %c0_19 = arith.constant 0 : index
    %32 = vector.load %arg6[%c0_18, %c0_19] : memref<8x128xbf16, #tpu.memory_space<vmem>>, vector<8x128xbf16>
    tpu.vector_store %arg6[%c0_18, %c0_19], %31 {strides = array<i32>} : memref<8x128xbf16, #tpu.memory_space<vmem>>, vector<8x128xbf16>,
    return
  }
  func.func @transform_0(%arg0: i32) -> (i32, i32) {
    %c0_i32 = arith.constant 0 : i32
    %c0_i32_0 = arith.constant 0 : i32
    return %arg0, %c0_i32 : i32, i32
  }
  func.func @transform_1(%arg0: i32) -> (i32, i32) {
    %c0_i32 = arith.constant 0 : i32
    %c0_i32_0 = arith.constant 0 : i32
    %c0_i32_1 = arith.constant 0 : i32
    return %c0_i32, %c0_i32_0 : i32, i32
  }
  func.func @transform_2(%arg0: i32) -> (i32, i32) {
    %c0_i32 = arith.constant 0 : i32
    %c0_i32_0 = arith.constant 0 : i32
    %c0_i32_1 = arith.constant 0 : i32
    return %c0_i32, %c0_i32_0 : i32, i32
  }
  func.func @transform_3(%arg0: i32) -> (i32, i32) {
    %c0_i32 = arith.constant 0 : i32
    %c0_i32_0 = arith.constant 0 : i32
    %c0_i32_1 = arith.constant 0 : i32
    return %c0_i32, %c0_i32_0 : i32, i32
  }
  func.func @transform_4(%arg0: i32) -> (i32, i32) {
    %c0_i32 = arith.constant 0 : i32
    %c0_i32_0 = arith.constant 0 : i32
    %c0_i32_1 = arith.constant 0 : i32
    return %c0_i32, %c0_i32_0 : i32, i32
  }
  func.func @transform_5(%arg0: i32) -> (i32, i32) {
    %c0_i32 = arith.constant 0 : i32
    %c0_i32_0 = arith.constant 0 : i32
    return %arg0, %c0_i32 : i32, i32
  }
}

</mosaic_0001>

<bundles_post_ra>
// kernel: tpu_custom_call.1
= control target key start
LH: loop header
LB: loop body
LE: loop exit
PB: predicated region body
PF: predicated region fallthrough
CT: control target
= control target key end

     0   :  { %10 = vsyncpa [#allocation3], 0  ;;  %s1134_s0 = inlined_call_operand.hbm [shape: f32[8,784], index: 0, kind: input, shape index: {}]   ;;  %s1135_s1 = inlined_call_operand.hbm [shape: bf16[784,128], index: 1, kind: input, shape index: {}]   ;;  %s1136_s2 = inlined_call_operand.vmem [shape: f32[1,128], index: 2, kind: input, shape index: {}]   ;;  %s1137_s3 = inlined_call_operand.hbm [shape: bf16[128,128], index: 3, kind: input, shape index: {}]   ;;  %s1138_s4 = inlined_call_operand.vmem [shape: f32[1,128], index: 4, kind: input, shape index: {}]   ;;  %s1139_s5 = inlined_call_operand.hbm [shape: bf16[8,128], index: 5, kind: output, shape index: {}]  }
   0x1   :  { %11 = vsyncpa [#allocation6], 0  ;;  %s28_s20 = sshll.u32 %s1135_s1, 4  ;;  %s29_s20 = int_to_ptr.hbm [resolvable:$true] %s28_s20 }
   0x2   :  { %12 = vsyncpa [#allocation4], 0  ;;  %s1080_s21 = smov [#allocation5]   ;;  %s18_s25 = sshll.u32 %s1134_s0, 4  ;;  %s19_s25 = int_to_ptr.hbm [resolvable:$true] %s18_s25 }
   0x3   :  { %s30_s22 = sshll.u32 %s1080_s21, 4  ;;  %s1081_s26 = smov 64   ;;  %s31_s22 = int_to_ptr.vmem [resolvable:$true] %s30_s22 }
   0x4   :  { %s1082_s27 = smov 4   ;;  %s1083_s28 = smov [#allocation2]  }
   0x5   :  { %36 = dma.hbm_to_vmem [thread:$0]  %s29_s20, 6272, %s31_s22, [#allocation6], %s1081_s26, %s1081_s26, %s1082_s27  }
   0x6   :  { %s20_s29 = sshll.u32 %s1083_s28, 4  ;;  %s43_s7 = sshll.u32 %s1137_s3, 4  ;;  %s21_s29 = int_to_ptr.vmem [resolvable:$true] %s20_s29  ;;  %s44_s7 = int_to_ptr.hbm [resolvable:$true] %s43_s7 }
   0x7   :  { %23 = dma.hbm_to_vmem [thread:$0]  %s19_s25, 896, %s21_s29, [#allocation3]  }
   0x8   :  { %s1084_s1 = smov [#allocation7]  }
   0x9   :  { %s45_s8 = sshll.u32 %s1084_s1, 4  ;;  %s46_s8 = int_to_ptr.vmem [resolvable:$true] %s45_s8 }
   0xa   :  { %51 = dma.hbm_to_vmem [thread:$0]  %s44_s7, 1024, %s46_s8, [#allocation6], %s1081_s26, %s1081_s26, %s1082_s27  }
   0xb   :  { %1074 = dma.done.wait [#allocation3], 896  }
   0xc   :  { %1075 = vsyncadd [#allocation3], 4294966400 }
   0xd   :  { %1076 = dma.done.wait [#allocation6], 7296  }
   0xe   :  { %1077 = vsyncadd [#allocation6], 4294960000  ;;  %v920_v0 = vld [vmem:[#allocation5 + $0x38] sm:$0xff]  ;;  %v919_v3 = vld [vmem:[#allocation5 + $0x30] sm:$0xff]  ;;  %vm477_vm0 = vcmask 130048   ;;  %s1085_s10 = smov [#allocation8]  }
   0xf   :  { %v928_v1 = vld [vmem:[#allocation5 + $0x78] sm:$0xff]  ;;  %481 = vmatpush.bf16.msra.mxu0 %v920_v0  ;;  %v927_v4 = vld [vmem:[#allocation5 + $0x70] sm:$0xff]  ;;  %v918_v8 = vld [vmem:[#allocation5 + $0x28] sm:$0xff]  ;;  %s671_s11 = sshll.u32 %s1085_s10, 4  ;;  %s673_s14 = sshll.u32 %s1139_s5, 4  ;;  %s672_s11 = int_to_ptr.vmem [resolvable:$true] %s671_s11  ;;  %s674_s14 = int_to_ptr.hbm [resolvable:$true] %s673_s14 }
  0x10   :  { %v936_v2 = vld [vmem:[#allocation5 + $0xb8] sm:$0xff]  ;;  %494 = vmatpush.bf16.msra.mxu1 %v928_v1  ;;  %v935_v5 = vld [vmem:[#allocation5 + $0xb0] sm:$0xff]  ;;  %v926_v9 = vld [vmem:[#allocation5 + $0x68] sm:$0xff] }
  0x11   :  { %507 = vmatpush.bf16.msra.mxu2 %v936_v2  ;;  %v944_v6 = vld [vmem:[#allocation5 + $0xf8] sm:$0xff]  ;;  %v943_v7 = vld [vmem:[#allocation5 + $0xf0] sm:$0xff]  ;;  %v934_v10 = vld [vmem:[#allocation5 + $0xa8] sm:$0xff] }
  0x12   :  { %520 = vmatpush.bf16.msra.mxu3 %v944_v6  ;;  %v942_v11 = vld [vmem:[#allocation5 + $0xe8] sm:$0xff]  ;;  %v917_v12 = vld [vmem:[#allocation5 + $0x20] sm:$0xff]  ;;  %v916_v16 = vld [vmem:[#allocation5 + $0x18] sm:$0xff] }
  0x13   :  { %482 = vmatpush.bf16.msra.mxu0 %v919_v3  ;;  %v925_v13 = vld [vmem:[#allocation5 + $0x60] sm:$0xff]  ;;  %v924_v17 = vld [vmem:[#allocation5 + $0x58] sm:$0xff]  ;;  %v915_v20 = vld [vmem:[#allocation5 + $0x10] sm:$0xff] }
  0x14   :  { %495 = vmatpush.bf16.msra.mxu1 %v927_v4  ;;  %v933_v14 = vld [vmem:[#allocation5 + $0xa0] sm:$0xff]  ;;  %v932_v18 = vld [vmem:[#allocation5 + $0x98] sm:$0xff]  ;;  %v923_v21 = vld [vmem:[#allocation5 + $0x50] sm:$0xff] }
  0x15   :  { %508 = vmatpush.bf16.msra.mxu2 %v935_v5  ;;  %v941_v15 = vld [vmem:[#allocation5 + $0xe0] sm:$0xff]  ;;  %v940_v19 = vld [vmem:[#allocation5 + $0xd8] sm:$0xff]  ;;  %v931_v22 = vld [vmem:[#allocation5 + $0x90] sm:$0xff] }
  0x16   :  { %521 = vmatpush.bf16.msra.mxu3 %v943_v7  ;;  %v939_v23 = vld [vmem:[#allocation5 + $0xd0] sm:$0xff]  ;;  %v914_v24 = vld [vmem:[#allocation5 + $0x8] sm:$0xff]  ;;  %v913_v27 = vld [vmem:[#allocation5] sm:$0xff] }
  0x17   :  { %483 = vmatpush.bf16.msra.mxu0 %v918_v8  ;;  %v922_v25 = vld [vmem:[#allocation5 + $0x48] sm:$0xff]  ;;  %v921_v29 = vld [vmem:[#allocation5 + $0x40] sm:$0xff]  ;;  %v68_v31 = vld [vmem:[#allocation2 + $0x8] sm:$0xff] }
  0x18   :  { %496 = vmatpush.bf16.msra.mxu1 %v926_v9  ;;  %v930_v26 = vld [vmem:[#allocation5 + $0x88] sm:$0xff]  ;;  %v952_v32 = vld [vmem:[#allocation5 + $0x138] sm:$0xff]  ;;  %v929_v34 = vld [vmem:[#allocation5 + $0x80] sm:$0xff]  ;;  %v75_v37 = vpack.c.bf16 %v68_v31, %v68_v31 }
  0x19   :  { %509 = vmatpush.bf16.msra.mxu2 %v934_v10  ;;  %v938_v28 = vld [vmem:[#allocation5 + $0xc8] sm:$0xff]  ;;  %v960_v33 = vld [vmem:[#allocation5 + $0x178] sm:$0xff]  ;;  %v937_v38 = vld [vmem:[#allocation5 + $0xc0] sm:$0xff] }
  0x1a   :  { %522 = vmatpush.bf16.msra.mxu3 %v942_v11  ;;  %v67_v30 = vld [vmem:[#allocation2] sm:$0xff]  ;;  %v69_v35 = vld [vmem:[#allocation2 + $0x10] sm:$0xff]  ;;  %v961_v39 = vld [vmem:[#allocation5 + $0x180] sm:$0xff] }
  0x1b   :  { %484 = vmatpush.bf16.msra.mxu0 %v917_v12  ;;  %v74_v36 = vpack.c.bf16 %v67_v30, %v67_v30  ;;  %v70_v40 = vld [vmem:[#allocation2 + $0x18] sm:$0xff]  ;;  %v951_v41 = vld [vmem:[#allocation5 + $0x130] sm:$0xff]  ;;  %v76_v43 = vpack.c.bf16 %v69_v35, %v69_v35  ;;  %v950_v45 = vld [vmem:[#allocation5 + $0x128] sm:$0xff] }
  0x1c   :  { %497 = vmatpush.bf16.msra.mxu1 %v925_v13  ;;  %v959_v42 = vld [vmem:[#allocation5 + $0x170] sm:$0xff]  ;;  %v77_v44 = vpack.c.bf16 %v70_v40, %v70_v40  ;;  %v958_v46 = vld [vmem:[#allocation5 + $0x168] sm:$0xff]  ;;  %v949_v47 = vld [vmem:[#allocation5 + $0x120] sm:$0xff] }
  0x1d   :  { %510 = vmatpush.bf16.msra.mxu2 %v933_v14  ;;  %v957_v48 = vld [vmem:[#allocation5 + $0x160] sm:$0xff]  ;;  %v948_v49 = vld [vmem:[#allocation5 + $0x118] sm:$0xff]  ;;  %v947_v52 = vld [vmem:[#allocation5 + $0x110] sm:$0xff] }
  0x1e   :  { %523 = vmatpush.bf16.msra.mxu3 %v941_v15  ;;  %v956_v50 = vld [vmem:[#allocation5 + $0x158] sm:$0xff]  ;;  %v955_v53 = vld [vmem:[#allocation5 + $0x150] sm:$0xff]  ;;  %v946_v55 = vld [vmem:[#allocation5 + $0x108] sm:$0xff] }
  0x1f   :  { %485 = vmatpush.bf16.msra.mxu0 %v916_v16  ;;  %v73_v51 = vld [vmem:[#allocation2 + $0x30] sm:$0xff]  ;;  %v954_v56 = vld [vmem:[#allocation5 + $0x148] sm:$0xff]  ;;  %v945_v57 = vld [vmem:[#allocation5 + $0x100] sm:$0xff] }
  0x20   :  { %498 = vmatpush.bf16.msra.mxu1 %v924_v17  ;;  %v80_v54 = vpack.c.bf16 %v73_v51, %v73_v51  ;;  %v953_v58 = vld [vmem:[#allocation5 + $0x140] sm:$0xff]  ;;  %v71_v59 = vld [vmem:[#allocation2 + $0x20] sm:$0xff]  ;;  %v72_v60 = vld [vmem:[#allocation2 + $0x28] sm:$0xff] }
  0x21   :  { %511 = vmatpush.bf16.msra.mxu2 %v932_v18  ;;  %v78_v61 = vpack.c.bf16 %v71_v59, %v71_v59  ;;  %v79_v62 = vpack.c.bf16 %v72_v60, %v72_v60  ;;  %v969_v63 = vld [vmem:[#allocation7 + $0x38] sm:$0xff]  ;;  %v968_v0 = vld [vmem:[#allocation7 + $0x30] sm:$0xff]  ;;  %v967_v1 = vld [vmem:[#allocation7 + $0x28] sm:$0xff] }
  0x22   :  { %524 = vmatpush.bf16.msra.mxu3 %v940_v19  ;;  %v966_v2 = vld [vmem:[#allocation7 + $0x20] sm:$0xff]  ;;  %v965_v3 = vld [vmem:[#allocation7 + $0x18] sm:$0xff]  ;;  %v964_v6 = vld [vmem:[#allocation7 + $0x10] sm:$0xff] }
  0x23   :  { %486 = vmatpush.bf16.msra.mxu0 %v915_v20  ;;  %v963_v7 = vld [vmem:[#allocation7 + $0x8] sm:$0xff]  ;;  %v962_v12 = vld [vmem:[#allocation7] sm:$0xff] }
  0x24   :  { %499 = vmatpush.bf16.msra.mxu1 %v923_v21  ;;  %v976_v13 = vld [vmem:[%s1136_s2] ss:$0 sm:$0xff] }
  0x25   :  { %512 = vmatpush.bf16.msra.mxu2 %v931_v22  ;;  %v977_v35 = vld [vmem:[%s1138_s4] ss:$0 sm:$0xff] }
  0x26   :  { %525 = vmatpush.bf16.msra.mxu3 %v939_v23 }
  0x27   :  { %487 = vmatpush.bf16.msra.mxu0 %v914_v24 }
  0x28   :  { %500 = vmatpush.bf16.msra.mxu1 %v922_v25 }
  0x29   :  { %513 = vmatpush.bf16.msra.mxu2 %v930_v26 }
  0x2a   :  { %526 = vmatpush.bf16.msra.mxu3 %v938_v28 }
  0x2b   :  { %488 = vmatpush.bf16.msra.mxu0 %v913_v27 }
  0x2c   :  { %501 = vmatpush.bf16.msra.mxu1 %v921_v29 }
  0x2d   :  { %514 = vmatpush.bf16.msra.mxu2 %v929_v34 }
  0x2e   :  { %489 = vmatmul.bf16.vlgmr.msra.gmra.mxu0 %v74_v36  ;;  %527 = vmatpush.bf16.msra.mxu3 %v937_v38 }
  0x2f   :  { %533 = vmatpush.bf16.msrb.mxu0 %v952_v32  ;;  %502 = vmatmul.bf16.vlgmr.msra.gmra.mxu1 %v75_v37 }
  0x30   :  { %546 = vmatpush.bf16.msrb.mxu1 %v960_v33  ;;  %515 = vmatmul.bf16.vlgmr.msra.gmra.mxu2 %v76_v43 }
  0x31   :  { %566 = vmatpush.bf16.msrb.mxu2 %v961_v39  ;;  %528 = vmatmul.bf16.vlgmr.msra.gmra.mxu3 %v77_v44 }
  0x32   :  { %646 = vmatpush.bf16.msrb.mxu3 %v969_v63 }
  0x33   :  { %534 = vmatpush.bf16.msrb.mxu0 %v951_v41 }
  0x34   :  { %547 = vmatpush.bf16.msrb.mxu1 %v959_v42 }
  0x36   :  { %647 = vmatpush.bf16.msrb.mxu3 %v968_v0 }
  0x37   :  { %535 = vmatpush.bf16.msrb.mxu0 %v950_v45 }
  0x38   :  { %548 = vmatpush.bf16.msrb.mxu1 %v958_v46 }
  0x3a   :  { %648 = vmatpush.bf16.msrb.mxu3 %v967_v1 }
  0x3b   :  { %536 = vmatpush.bf16.msrb.mxu0 %v949_v47 }
  0x3c   :  { %549 = vmatpush.bf16.msrb.mxu1 %v957_v48 }
  0x3e   :  { %649 = vmatpush.bf16.msrb.mxu3 %v966_v2 }
  0x3f   :  { %537 = vmatpush.bf16.msrb.mxu0 %v948_v49 }
  0x40   :  { %550 = vmatpush.bf16.msrb.mxu1 %v956_v50  ;;  %880 = vmatmul.msk.bf16.vlgmr.msrb.gmra.mxu2 %vm477_vm0, %v80_v54 }
  0x42   :  { %650 = vmatpush.bf16.msrb.mxu3 %v965_v3 }
  0x43   :  { %538 = vmatpush.bf16.msrb.mxu0 %v947_v52 }
  0x44   :  { %551 = vmatpush.bf16.msrb.mxu1 %v955_v53 }
  0x46   :  { %651 = vmatpush.bf16.msrb.mxu3 %v964_v6 }
  0x47   :  { %539 = vmatpush.bf16.msrb.mxu0 %v946_v55 }
  0x48   :  { %552 = vmatpush.bf16.msrb.mxu1 %v954_v56 }
  0x4a   :  { %652 = vmatpush.bf16.msrb.mxu3 %v963_v7 }
  0x4b   :  { %540 = vmatpush.bf16.msrb.mxu0 %v945_v57 }
  0x4c   :  { %553 = vmatpush.bf16.msrb.mxu1 %v953_v58 }
  0x4e   :  { %541 = vmatmul.bf16.vlgmr.msrb.gmra.mxu0 %v78_v61  ;;  %653 = vmatpush.bf16.msrb.mxu3 %v962_v12 }
  0x4f   :  { %554 = vmatmul.bf16.vlgmr.msrb.gmra.mxu1 %v79_v62 }
  0xab   :  { %v490_v4 = vpop.f32.mrf.mxu0 }
  0xac   :  { %v503_v5 = vpop.f32.mrf.mxu1  ;;  %v491_v14 = vadd.f32 %v976_v13, %v490_v4 }
  0xae   :  { %v504_v17 = vadd.f32 %v503_v5, %v491_v14 }
  0xb3   :  { %v492_v8 = vpop.f32.mrf.mxu0  ;;  %v516_v10 = vpop.f32.mrf.mxu2 }
  0xb4   :  { %v505_v9 = vpop.f32.mrf.mxu1  ;;  %v529_v11 = vpop.f32.mrf.mxu3  ;;  %v517_v18 = vadd.f32 %v516_v10, %v504_v17 }
  0xb6   :  { %v530_v20 = vadd.f32 %v529_v11, %v517_v18 }
  0xbb   :  { %v518_v15 = vpop.f32.mrf.mxu2 }
  0xbc   :  { %v531_v16 = vpop.f32.mrf.mxu3 }
  0xc3   :  { %v568_v19 = vpop.f32.mrf.mxu2 }
  0xcb   :  { %v542_v21 = vpop.f32.mrf.mxu0  ;;  %v570_v25 = vpop.f32.mrf.mxu2 }
  0xcc   :  { %v555_v22 = vpop.f32.mrf.mxu1  ;;  %v543_v23 = vadd.f32 %v542_v21, %v530_v20 }
  0xce   :  { %v556_v24 = vadd.f32 %v555_v22, %v543_v23 }
  0xd0   :  { %v569_v26 = vadd.f32 %v568_v19, %v556_v24 }
  0xd2   :  { %v572_v27 = vadd.f32 3.0, %v569_v26 }
  0xd3   :  { %v544_v28 = vpop.f32.mrf.mxu0 }
  0xd4   :  { %v557_v29 = vpop.f32.mrf.mxu1  ;;  %v573_v30 = vmax.f32 %v572_v27, 0.0 }
  0xd6   :  { %v574_v31 = vmin.f32 %v573_v30, 6.0 }
  0xd8   :  { %v575_v32 = vmul.f32 %v574_v31, %v569_v26 }
  0xda   :  { %v576_v33 = vmul.f32 0.16666667, %v575_v32 }
  0xdc   :  { %v577_v34 = vpack.c.bf16 %v576_v33, %v576_v33 }
  0xde   :  { %654 = vmatmul.bf16.vlgmr.msrb.gmra.mxu3 %v577_v34 }
 0x161   :  { %v655_v36 = vpop.f32.mrf.mxu3 }
 0x162   :  { %v656_v37 = vadd.f32 %v977_v35, %v655_v36 }
 0x164   :  { %v659_v38 = vadd.f32 3.0, %v656_v37 }
 0x166   :  { %v660_v39 = vmax.f32 %v659_v38, 0.0 }
 0x168   :  { %v661_v40 = vmin.f32 %v660_v39, 6.0 }
 0x169   :  { %v657_v41 = vpop.f32.mrf.mxu3 }
 0x16a   :  { %v662_v42 = vmul.f32 %v661_v40, %v656_v37 }
 0x16c   :  { %v663_v43 = vmul.f32 0.16666667, %v662_v42 }
 0x16e   :  { %v664_v44 = vpack.c.bf16 %v663_v43, %v663_v43 }
 0x170   :  { %665 = vst [vmem:[#allocation8] sm:$0xf] %v664_v44 }
 0x171   :  { %676 = dma.vmem_to_hbm [thread:$0]  %s672_s11, 64, %s674_s14, [#allocation4]  }
 0x172   :  { %1078 = dma.done.wait [#allocation4], 64  }
 0x173   :  { %1079 = vsyncadd [#allocation4], 4294967232 }
 0x174   :  { %681 = vsyncpa [#allocation3], 1 }
 0x175   :  { %682 = vsyncpa [#allocation6], 1 }
 0x176   :  { %683 = vsyncpa [#allocation4], 1 }

</bundles_post_ra>
